<compile_context>
chip_gen: v5e
topology: v5e:2x2
jax: 0.10.0
libtpu: 0.0.40
codegen_flags: <defaults>
</compile_context>

<pallas_src>
import jax
import jax.numpy as jnp
from jax.experimental import pallas as pl
from jax.experimental.pallas import tpu as pltpu

EPS = 1e-6


def _sublayer_connection_kernel(x_ref, a2_ref, b2_ref, w_ref, bw_ref, o_ref, normed_scr):
    # x_ref     : (TM, D)  row tile of the input (native dtype)
    # a2_ref    : (1, D)   LayerNorm scale (f32), resident
    # b2_ref    : (1, D)   LayerNorm shift (f32), resident
    # w_ref     : (D, TN)  sublayer (Linear) weight tile, bf16, y = normed @ W
    # bw_ref    : (1, TN)  sublayer (Linear) bias tile (f32)
    # o_ref     : (TM, TN) output tile
    # normed_scr: (TM, D)  bf16 scratch holding LayerNorm(x) for this row tile
    j = pl.program_id(1)
    d = x_ref.shape[-1]
    tn = o_ref.shape[-1]

    # ---- LayerNorm once per row tile (j == 0), reused across all N tiles ----
    @pl.when(j == 0)
    def _():
        xf = x_ref[...].astype(jnp.float32)
        # Two independent reductions (overlap on the XLUs) instead of reduce->sub->reduce.
        s1 = jnp.sum(xf, axis=-1, keepdims=True)
        s2 = jnp.sum(xf * xf, axis=-1, keepdims=True)
        inv_d = 1.0 / float(d)
        mean = s1 * inv_d
        # Unbiased variance (divide by D-1), eps added to std: matches the reference module.
        var = jnp.maximum((s2 * inv_d - mean * mean) * (float(d) / float(d - 1)), 0.0)
        std = jnp.sqrt(var)
        inv_std = pl.reciprocal(std + EPS, approx=True)   # EUP, off the VPU critical path
        normed = a2_ref[...] * ((xf - mean) * inv_std) + b2_ref[...]
        normed_scr[...] = normed.astype(jnp.bfloat16)

    # ---- sublayer: Linear on the MXU, bf16 operands, f32 accumulate ----
    y = jnp.dot(normed_scr[...], w_ref[...],
                preferred_element_type=jnp.float32) + bw_ref[...]

    # ---- dropout (inference mode => identity) + residual; x re-read after the dot ----
    if tn == d:
        xres = x_ref[...]
    else:
        col0 = pl.multiple_of(j * tn, tn)
        xres = x_ref[:, pl.ds(col0, tn)]
    o_ref[...] = (xres.astype(jnp.float32) + y).astype(o_ref.dtype)


def _vmem_capacity_bytes():
    try:
        return int(pltpu.get_tpu_info().vmem_capacity_bytes)
    except Exception:
        return 64 << 20   # conservative fallback (v7x per-TC VMEM)


def _choose_tn(d, vmem_cap):
    """Keep the bf16 weight fully resident (single-buffered) if it fits ~1/3 of VMEM,
    otherwise tile the weight/output N dimension so VMEM stays bounded (v7x)."""
    if d * d * 2 <= vmem_cap // 3:
        return d
    for cand in (512, 256, 128):
        if d % cand == 0:
            return cand
    return d


def _vmem_plan(d, tn, itemsize):
    """(fixed_bytes, per_row_bytes) with the real buffer counts and f32 intermediates."""
    n_tiles = d // tn
    w_bufs = 1 if n_tiles == 1 else 2          # resident => Buffered(1); N-tiled => pipelined
    fixed = d * tn * 2 * w_bufs                # bf16 weight buffer(s)
    fixed += 2 * d * 4                         # a2 + b2 (single-buffered f32)
    fixed += (1 if n_tiles == 1 else 2) * tn * 4   # bias buffer(s)
    per_row = (2 * d * itemsize                # x tile, double-buffered
               + 2 * tn * itemsize             # out tile, double-buffered
               + d * 2                         # normed scratch (bf16)
               + 4 * d * 4)                    # f32 intermediates (xf, centered, normed, y)
    return fixed, per_row


def _choose_tm(m, d, tn, itemsize, vmem_cap):
    fixed, per_row = _vmem_plan(d, tn, itemsize)
    budget = int(vmem_cap * 0.75)              # headroom for Mosaic internals / spills
    tm = max((budget - fixed) // per_row, 8)
    # 512 rows already saturates ~85% of the HBM roofline; larger only bloats intermediates
    # and reduces grid steps available for v7x 2-TC sharding and DMA/compute overlap.
    tm = int(min(tm, 512, m))
    tm = max(8, (tm // 8) * 8)                 # sublane alignment
    return tm


def sublayer_connection(x, a2, b2, w, bw, *, tm=None, tn=None):
    """x: (batch, seq, hidden). Returns x + Linear(LayerNorm(x)) (dropout = identity)."""
    batch, seq, hidden = x.shape
    assert hidden >= 2
    m = batch * seq
    itemsize = jnp.dtype(x.dtype).itemsize
    x2d = x.reshape(m, hidden)

    vmem_cap = _vmem_capacity_bytes()
    if tn is None:
        tn = _choose_tn(hidden, vmem_cap)
    assert hidden % tn == 0
    n_tiles = hidden // tn
    if tm is None:
        tm = _choose_tm(m, hidden, tn, itemsize, vmem_cap)

    # No wrapper-side pad: rows are independent, so the masked last partial block is safe.
    grid_m = pl.cdiv(m, tm)

    # Weight kept in VMEM as bf16 (half the HBM traffic / VMEM footprint), f32 accumulate.
    w_bf16 = w.astype(jnp.bfloat16)
    a2r = a2.reshape(1, hidden).astype(jnp.float32)
    b2r = b2.reshape(1, hidden).astype(jnp.float32)
    bwr = bw.reshape(1, hidden).astype(jnp.float32)

    resident = pl.Buffered(1)   # grid-constant operands: one buffer, not two

    x_spec = pl.BlockSpec((tm, hidden), lambda i, j: (i, 0))
    a2_spec = pl.BlockSpec((1, hidden), lambda i, j: (0, 0), pipeline_mode=resident)
    b2_spec = pl.BlockSpec((1, hidden), lambda i, j: (0, 0), pipeline_mode=resident)
    if n_tiles == 1:
        w_spec = pl.BlockSpec((hidden, tn), lambda i, j: (0, 0), pipeline_mode=resident)
        bw_spec = pl.BlockSpec((1, tn), lambda i, j: (0, 0), pipeline_mode=resident)
    else:
        w_spec = pl.BlockSpec((hidden, tn), lambda i, j: (0, j))
        bw_spec = pl.BlockSpec((1, tn), lambda i, j: (0, j))
    out_spec = pl.BlockSpec((tm, tn), lambda i, j: (i, j))

    # Generation-aware VMEM limit: real buffer counts + intermediates, 1.5x margin,
    # clamped below the physical capacity reported for this chip.
    fixed, per_row = _vmem_plan(hidden, tn, itemsize)
    needed = fixed + per_row * tm
    vmem_limit = int(max(min(needed * 3 // 2, int(vmem_cap * 0.9)), 16 << 20))

    cost = pl.CostEstimate(
        flops=2 * m * hidden * hidden,
        transcendentals=m,   # one approx reciprocal per row
        bytes_accessed=2 * m * hidden * itemsize + hidden * hidden * 2 + 4 * hidden * 4,
    )

    out = pl.pallas_call(
        _sublayer_connection_kernel,
        out_shape=jax.ShapeDtypeStruct((m, hidden), x.dtype),
        grid=(grid_m, n_tiles),
        in_specs=[x_spec, a2_spec, b2_spec, w_spec, bw_spec],
        out_specs=out_spec,
        scratch_shapes=[pltpu.VMEM((tm, hidden), jnp.bfloat16)],
        compiler_params=pltpu.CompilerParams(
            # Row tiles are independent (parallel, shards across v7x's 2 TCs); the N axis
            # carries the normed scratch across j so it must be sequential (arbitrary).
            dimension_semantics=("parallel", "arbitrary"),
            vmem_limit_bytes=vmem_limit,
        ),
        cost_estimate=cost,
    )(x2d, a2r, b2r, w_bf16, bwr)

    return out.reshape(batch, seq, hidden)


def _reference(x, a2, b2, w, bw):
    """Pure-JAX reference with matching bf16-operand / f32-accumulate matmul."""
    xf = x.astype(jnp.float32)
    d = xf.shape[-1]
    mean = jnp.mean(xf, axis=-1, keepdims=True)
    xc = xf - mean
    std = jnp.sqrt(jnp.sum(xc * xc, axis=-1, keepdims=True) / (d - 1))
    normed = a2 * xc / (std + EPS) + b2
    y = jnp.dot(normed.astype(jnp.bfloat16), w.astype(jnp.bfloat16),
                preferred_element_type=jnp.float32) + bw
    return (xf + y).astype(x.dtype)


if __name__ == "__main__":
    # Small but lane-dense demo shape (hidden multiple of 128 keeps stores unmasked).
    batch, seq, hidden = 2, 8, 128
    key = jax.random.PRNGKey(0)
    kx, kw, kb = jax.random.split(key, 3)

    x = jax.random.normal(kx, (batch, seq, hidden), dtype=jnp.float32)

    # LayerNorm params (torch init: a_2 = ones, b_2 = zeros)
    a2 = jnp.ones((hidden,), dtype=jnp.float32)
    b2 = jnp.zeros((hidden,), dtype=jnp.float32)

    # Deterministic synthetic sublayer = Linear(hidden, hidden)
    w = 0.05 * jax.random.normal(kw, (hidden, hidden), dtype=jnp.float32)
    bw = 0.01 * jax.random.normal(kb, (hidden,), dtype=jnp.float32)

    out = sublayer_connection(x, a2, b2, w, bw)
    out = jax.block_until_ready(out)

    ref = _reference(x, a2, b2, w, bw)
    assert out.shape == x.shape and out.dtype == x.dtype
    assert jnp.allclose(out, ref, atol=2e-2, rtol=2e-2), "mismatch vs reference"

    print("KERNEL_OK")
</pallas_src>

<mosaic_0001>
module attributes {stable_mosaic.version = 11 : i64} {
  func.func @_sublayer_connection_kernel(%arg0: i32, %arg1: i32, %arg2: memref<16x128xf32, #tpu.memory_space<vmem>>, %arg3: memref<1x128xf32, #tpu.memory_space<vmem>>, %arg4: memref<1x128xf32, #tpu.memory_space<vmem>>, %arg5: memref<128x128xbf16, #tpu.memory_space<vmem>>, %arg6: memref<1x128xf32, #tpu.memory_space<vmem>>, %arg7: memref<16x128xf32, #tpu.memory_space<vmem>>, %arg8: memref<16x128xbf16, #tpu.memory_space<vmem>>) attributes {dimension_semantics = [#tpu.dimension_semantics<parallel>, #tpu.dimension_semantics<arbitrary>], iteration_bounds = array<i64: 1, 1>, scalar_prefetch = 0 : i64, scratch_operands = 1 : i64, tpu.core_type = #tpu.core_type<tc>, window_params = [{transform_indices = @transform_0, window_bounds = array<i64: 16, 128>}, {pipeline_mode = #tpu.pipeline_mode<synchronous>, transform_indices = @transform_1, window_bounds = array<i64: 1, 128>}, {pipeline_mode = #tpu.pipeline_mode<synchronous>, transform_indices = @transform_2, window_bounds = array<i64: 1, 128>}, {pipeline_mode = #tpu.pipeline_mode<synchronous>, transform_indices = @transform_3, window_bounds = array<i64: 128, 128>}, {pipeline_mode = #tpu.pipeline_mode<synchronous>, transform_indices = @transform_4, window_bounds = array<i64: 1, 128>}, {transform_indices = @transform_5, window_bounds = array<i64: 16, 128>}]} {
    %c0_i32 = arith.constant 0 : i32
    %0 = arith.cmpi eq, %arg1, %c0_i32 : i32
    %1 = arith.extui %0 : i1 to i32
    %c0_i32_0 = arith.constant 0 : i32
    %2 = arith.cmpi ne, %1, %c0_i32_0 : i32
    scf.if %2 {
      %c0_10 = arith.constant 0 : index
      %c0_11 = arith.constant 0 : index
      %12 = vector.load %arg2[%c0_10, %c0_11] : memref<16x128xf32, #tpu.memory_space<vmem>>, vector<16x128xf32>
      %cst_12 = arith.constant dense<0.000000e+00> : vector<16xf32>
      %13 = vector.multi_reduction <add>, %12, %cst_12 [1] : vector<16x128xf32> to vector<16xf32>
      %14 = vector.shape_cast %13 : vector<16xf32> to vector<16x1xf32>
      %15 = arith.mulf %12, %12 : vector<16x128xf32>
      %cst_13 = arith.constant dense<0.000000e+00> : vector<16xf32>
      %16 = vector.multi_reduction <add>, %15, %cst_13 [1] : vector<16x128xf32> to vector<16xf32>
      %17 = vector.shape_cast %16 : vector<16xf32> to vector<16x1xf32>
      %cst_14 = arith.constant 7.812500e-03 : f32
      %18 = vector.broadcast %cst_14 : f32 to vector<16x1xf32>
      %19 = arith.mulf %14, %18 : vector<16x1xf32>
      %cst_15 = arith.constant 7.812500e-03 : f32
      %20 = vector.broadcast %cst_15 : f32 to vector<16x1xf32>
      %21 = arith.mulf %17, %20 : vector<16x1xf32>
      %22 = arith.mulf %19, %19 : vector<16x1xf32>
      %23 = arith.subf %21, %22 : vector<16x1xf32>
      %cst_16 = arith.constant 1.00787401 : f32
      %24 = vector.broadcast %cst_16 : f32 to vector<16x1xf32>
      %25 = arith.mulf %23, %24 : vector<16x1xf32>
      %cst_17 = arith.constant 0.000000e+00 : f32
      %26 = vector.broadcast %cst_17 : f32 to vector<16x1xf32>
      %27 = arith.maximumf %25, %26 : vector<16x1xf32>
      %28 = math.sqrt %27 : vector<16x1xf32>
      %cst_18 = arith.constant 9.99999997E-7 : f32
      %29 = vector.broadcast %cst_18 : f32 to vector<16x1xf32>
      %30 = arith.addf %28, %29 : vector<16x1xf32>
      %31 = tpu.reciprocal %30 {approx = true} : vector<16x1xf32> -> vector<16x1xf32>
      %c0_19 = arith.constant 0 : index
      %c0_20 = arith.constant 0 : index
      %32 = vector.load %arg3[%c0_19, %c0_20] : memref<1x128xf32, #tpu.memory_space<vmem>>, vector<1x128xf32>
      %33 = vector.broadcast %19 : vector<16x1xf32> to vector<16x128xf32>
      %34 = arith.subf %12, %33 : vector<16x128xf32>
      %35 = vector.broadcast %31 : vector<16x1xf32> to vector<16x128xf32>
      %36 = arith.mulf %34, %35 : vector<16x128xf32>
      %37 = vector.broadcast %32 : vector<1x128xf32> to vector<16x128xf32>
      %38 = arith.mulf %37, %36 : vector<16x128xf32>
      %c0_21 = arith.constant 0 : index
      %c0_22 = arith.constant 0 : index
      %39 = vector.load %arg4[%c0_21, %c0_22] : memref<1x128xf32, #tpu.memory_space<vmem>>, vector<1x128xf32>
      %40 = vector.broadcast %39 : vector<1x128xf32> to vector<16x128xf32>
      %41 = arith.addf %38, %40 : vector<16x128xf32>
      %42 = arith.truncf %41 : vector<16x128xf32> to vector<16x128xbf16>
      %c0_23 = arith.constant 0 : index
      %c0_24 = arith.constant 0 : index
      %43 = vector.load %arg8[%c0_23, %c0_24] : memref<16x128xbf16, #tpu.memory_space<vmem>>, vector<16x128xbf16>
      tpu.vector_store %arg8[%c0_23, %c0_24], %42 {strides = array<i32>} : memref<16x128xbf16, #tpu.memory_space<vmem>>, vector<16x128xbf16>,
    } else {
    }
    %c0 = arith.constant 0 : index
    %c0_1 = arith.constant 0 : index
    %3 = vector.load %arg8[%c0, %c0_1] : memref<16x128xbf16, #tpu.memory_space<vmem>>, vector<16x128xbf16>
    %c0_2 = arith.constant 0 : index
    %c0_3 = arith.constant 0 : index
    %4 = vector.load %arg5[%c0_2, %c0_3] : memref<128x128xbf16, #tpu.memory_space<vmem>>, vector<128x128xbf16>
    %cst = arith.constant dense<0.000000e+00> : vector<16x128xf32>
    %5 = tpu.matmul %3, %4, %cst {dimension_numbers = #tpu.dot_dimension_numbers<[1], [0], [0], [1], [0, 0, 1, 1], [], []>} : vector<16x128xbf16>, vector<128x128xbf16>, vector<16x128xf32> -> vector<16x128xf32>
    %c0_4 = arith.constant 0 : index
    %c0_5 = arith.constant 0 : index
    %6 = vector.load %arg6[%c0_4, %c0_5] : memref<1x128xf32, #tpu.memory_space<vmem>>, vector<1x128xf32>
    %7 = vector.broadcast %6 : vector<1x128xf32> to vector<16x128xf32>
    %8 = arith.addf %5, %7 : vector<16x128xf32>
    %c0_6 = arith.constant 0 : index
    %c0_7 = arith.constant 0 : index
    %9 = vector.load %arg2[%c0_6, %c0_7] : memref<16x128xf32, #tpu.memory_space<vmem>>, vector<16x128xf32>
    %10 = arith.addf %9, %8 : vector<16x128xf32>
    %c0_8 = arith.constant 0 : index
    %c0_9 = arith.constant 0 : index
    %11 = vector.load %arg7[%c0_8, %c0_9] : memref<16x128xf32, #tpu.memory_space<vmem>>, vector<16x128xf32>
    tpu.vector_store %arg7[%c0_8, %c0_9], %10 {strides = array<i32>} : memref<16x128xf32, #tpu.memory_space<vmem>>, vector<16x128xf32>,
    return
  }
  func.func @transform_0(%arg0: i32, %arg1: i32) -> (i32, i32) {
    %c0_i32 = arith.constant 0 : i32
    %c0_i32_0 = arith.constant 0 : i32
    return %arg0, %c0_i32 : i32, i32
  }
  func.func @transform_1(%arg0: i32, %arg1: i32) -> (i32, i32) {
    %c0_i32 = arith.constant 0 : i32
    %c0_i32_0 = arith.constant 0 : i32
    %c0_i32_1 = arith.constant 0 : i32
    return %c0_i32, %c0_i32_0 : i32, i32
  }
  func.func @transform_2(%arg0: i32, %arg1: i32) -> (i32, i32) {
    %c0_i32 = arith.constant 0 : i32
    %c0_i32_0 = arith.constant 0 : i32
    %c0_i32_1 = arith.constant 0 : i32
    return %c0_i32, %c0_i32_0 : i32, i32
  }
  func.func @transform_3(%arg0: i32, %arg1: i32) -> (i32, i32) {
    %c0_i32 = arith.constant 0 : i32
    %c0_i32_0 = arith.constant 0 : i32
    %c0_i32_1 = arith.constant 0 : i32
    return %c0_i32, %c0_i32_0 : i32, i32
  }
  func.func @transform_4(%arg0: i32, %arg1: i32) -> (i32, i32) {
    %c0_i32 = arith.constant 0 : i32
    %c0_i32_0 = arith.constant 0 : i32
    %c0_i32_1 = arith.constant 0 : i32
    return %c0_i32, %c0_i32_0 : i32, i32
  }
  func.func @transform_5(%arg0: i32, %arg1: i32) -> (i32, i32) {
    %c0_i32 = arith.constant 0 : i32
    return %arg0, %arg1 : i32, i32
  }
}

</mosaic_0001>

<bundles_post_ra>
// kernel: tpu_custom_call.1
= control target key start
LH: loop header
LB: loop body
LE: loop exit
PB: predicated region body
PF: predicated region fallthrough
CT: control target
= control target key end

     0   :  { %10 = vsyncpa [#allocation4], 0  ;;  %s510_s0 = inlined_call_operand.hbm [shape: f32[16,128], index: 0, kind: input, shape index: {}]   ;;  %s511_s1 = inlined_call_operand.hbm [shape: f32[1,128], index: 1, kind: input, shape index: {}]   ;;  %s512_s2 = inlined_call_operand.vmem [shape: f32[1,128], index: 2, kind: input, shape index: {}]   ;;  %s513_s3 = inlined_call_operand.hbm [shape: bf16[128,128], index: 3, kind: input, shape index: {}]   ;;  %s514_s4 = inlined_call_operand.vmem [shape: f32[1,128], index: 4, kind: input, shape index: {}]   ;;  %s515_s5 = inlined_call_operand.hbm [shape: f32[16,128], index: 5, kind: output, shape index: {}]  }
   0x1   :  { %11 = vsyncpa [#allocation7], 0  ;;  %s31_s20 = sshll.u32 %s511_s1, 4  ;;  %s32_s20 = int_to_ptr.hbm [resolvable:$true] %s31_s20 }
   0x2   :  { %12 = vsyncpa [#allocation5], 0  ;;  %s429_s21 = smov [#allocation6]   ;;  %s17_s25 = sshll.u32 %s510_s0, 4  ;;  %s18_s25 = int_to_ptr.hbm [resolvable:$true] %s17_s25 }
   0x3   :  { %s33_s22 = sshll.u32 %s429_s21, 4  ;;  %s430_s26 = smov [#allocation3]   ;;  %s34_s22 = int_to_ptr.vmem [resolvable:$true] %s33_s22 }
   0x4   :  { %36 = dma.hbm_to_vmem [thread:$0]  %s32_s20, 16, %s34_s22, [#allocation7]  }
   0x5   :  { %s19_s27 = sshll.u32 %s430_s26, 4  ;;  %s431_s28 = smov 128   ;;  %s20_s27 = int_to_ptr.vmem [resolvable:$true] %s19_s27 }
   0x6   :  { %s432_s29 = smov 8   ;;  %s43_s6 = sshll.u32 %s513_s3, 4  ;;  %s44_s6 = int_to_ptr.hbm [resolvable:$true] %s43_s6 }
   0x7   :  { %25 = dma.hbm_to_vmem [thread:$0]  %s18_s25, 256, %s20_s27, [#allocation4], %s431_s28, %s431_s28, %s432_s29  }
   0x8   :  { %s433_s7 = smov [#allocation8]   ;;  %s434_s0 = smov 64  }
   0x9   :  { %s45_s8 = sshll.u32 %s433_s7, 4  ;;  %s435_s9 = smov 4   ;;  %s46_s8 = int_to_ptr.vmem [resolvable:$true] %s45_s8 }
   0xa   :  { %51 = dma.hbm_to_vmem [thread:$0]  %s44_s6, 1024, %s46_s8, [#allocation7], %s434_s0, %s434_s0, %s435_s9  }
   0xb   :  { %423 = dma.done.wait [#allocation4], 256  }
   0xc   :  { %424 = vsyncadd [#allocation4], 4294967040 }
   0xd   :  { %425 = dma.done.wait [#allocation7], 1040  }
   0xe   :  { %426 = vsyncadd [#allocation7], 4294966256  ;;  %v479_v0 = vld [vmem:[#allocation3] sm:$0xff]  ;;  %v484_v2 = vld [vmem:[#allocation3 + $0x8] sm:$0xff]  ;;  %s436_s13 = smov [#allocation9]   ;;  %s244_s16 = sshll.u32 %s515_s5, 4  ;;  %s245_s16 = int_to_ptr.hbm [resolvable:$true] %s244_s16 }
   0xf   :  { %72 = vadd.xlane.f32.xlu0 %v479_v0  ;;  %v76_v1 = vmul.f32 %v479_v0, %v479_v0  ;;  %v77_v3 = vmul.f32 %v484_v2, %v484_v2  ;;  %v302_v9 = vld [vmem:[#allocation8 + $0x38] sm:$0xff]  ;;  %v301_v12 = vld [vmem:[#allocation8 + $0x30] sm:$0xff]  ;;  %v300_v17 = vld [vmem:[#allocation8 + $0x28] sm:$0xff]  ;;  %s242_s14 = sshll.u32 %s436_s13, 4  ;;  %s243_s14 = int_to_ptr.vmem [resolvable:$true] %s242_s14 }
  0x10   :  { %218 = vmatpush.bf16.msra.mxu0 %v302_v9  ;;  %v299_v21 = vld [vmem:[#allocation8 + $0x20] sm:$0xff]  ;;  %v298_v26 = vld [vmem:[#allocation8 + $0x18] sm:$0xff]  ;;  %v297_v28 = vld [vmem:[#allocation8 + $0x10] sm:$0xff] }
  0x11   :  { %78 = vadd.xlane.f32.xlu1 %v76_v1  ;;  %v296_v31 = vld [vmem:[#allocation8 + $0x8] sm:$0xff]  ;;  %v295_v38 = vld [vmem:[#allocation8] sm:$0xff]  ;;  %v316_v52 = vld [vmem:[#allocation6] ss:$0 sm:$0xff] }
  0x12   :  { %v317_v58 = vld [vmem:[%s512_s2] ss:$0 sm:$0xff] }
  0x13   :  { %v318_v1 = vld [vmem:[%s514_s4] ss:$0 sm:$0xff] }
  0x14   :  { %219 = vmatpush.bf16.msra.mxu0 %v301_v12 }
  0x17   :  { %74 = vadd.xlane.f32.xlu0 %v484_v2 }
  0x18   :  { %220 = vmatpush.bf16.msra.mxu0 %v300_v17 }
  0x19   :  { %80 = vadd.xlane.f32.xlu1 %v77_v3 }
  0x1c   :  { %221 = vmatpush.bf16.msra.mxu0 %v299_v21 }
  0x20   :  { %222 = vmatpush.bf16.msra.mxu0 %v298_v26 }
  0x24   :  { %223 = vmatpush.bf16.msra.mxu0 %v297_v28 }
  0x28   :  { %224 = vmatpush.bf16.msra.mxu0 %v296_v31 }
  0x2c   :  { %225 = vmatpush.bf16.msra.mxu0 %v295_v38 }
  0x82   :  { %v73_v4 = vpop.xlane.xlu0 %72 }
  0x83   :  { %v489_v5 = vmul.f32 0.0078125, %v73_v4 }
  0x84   :  { %v79_v6 = vpop.xlane.xlu1 %78 }
  0x85   :  { %v86_v7 = vmul.f32 %v489_v5, %v489_v5  ;;  %v84_v8 = vmul.f32 0.0078125, %v79_v6  ;;  %v123_v51 = vsub.f32 %v479_v0, %v489_v5 }
  0x87   :  { %v88_v10 = vsub.f32 %v84_v8, %v86_v7 }
  0x89   :  { %v90_v11 = vmul.f32 1.007874, %v88_v10 }
  0x8a   :  { %v75_v13 = vpop.xlane.xlu0 %74 }
  0x8b   :  { %v92_v14 = vmax.f32 %v90_v11, 0.0  ;;  %v83_v15 = vmul.f32 0.0078125, %v75_v13 }
  0x8c   :  { %v81_v16 = vpop.xlane.xlu1 %80 }
  0x8d   :  { %319 = vrsqrt.f32 %v92_v14  ;;  %v87_v18 = vmul.f32 %v83_v15, %v83_v15  ;;  %v85_v19 = vmul.f32 0.0078125, %v81_v16  ;;  %vm101_vm0 = vcmp.eq.f32.partialorder %v92_v14, inf }
  0x8e   :  { %v104_v36 = vand.u32 2147483648, %v92_v14  ;;  %vm103_vm1 = vcmp.eq.f32.partialorder %v92_v14, 0.0  ;;  %v124_v54 = vsub.f32 %v484_v2, %v83_v15 }
  0x8f   :  { %v89_v20 = vsub.f32 %v85_v19, %v87_v18 }
  0x91   :  { %v91_v22 = vmul.f32 1.007874, %v89_v20 }
  0x93   :  { %v320_v23 = vpop.eup %319  ;;  %v93_v25 = vmax.f32 %v91_v22, 0.0 }
  0x94   :  { %v95_v24 = vmul.f32 %v320_v23, %v92_v14 }
  0x95   :  { %321 = vrsqrt.f32 %v93_v25  ;;  %vm113_vm2 = vcmp.eq.f32.partialorder %v93_v25, inf  ;;  %v116_v46 = vand.u32 2147483648, %v93_v25  ;;  %vm115_vm3 = vcmp.eq.f32.partialorder %v93_v25, 0.0 }
  0x96   :  { %v96_v27 = vmul.f32 %v320_v23, %v95_v24 }
  0x98   :  { %v97_v29 = vmul.f32 0.5, %v96_v27 }
  0x9a   :  { %v98_v30 = vsub.f32 1.5, %v97_v29 }
  0x9b   :  { %v322_v32 = vpop.eup %321 }
  0x9c   :  { %v99_v33 = vmul.f32 %v320_v23, %v98_v30  ;;  %v107_v34 = vmul.f32 %v322_v32, %v93_v25 }
  0x9e   :  { %v100_v35 = vmul.f32 %v99_v33, %v92_v14  ;;  %v108_v37 = vmul.f32 %v322_v32, %v107_v34 }
  0xa0   :  { %v102_v39 = vsel %vm101_vm0, %v92_v14, %v100_v35  ;;  %v109_v41 = vmul.f32 0.5, %v108_v37 }
  0xa1   :  { %v105_v40 = vsel %vm103_vm1, %v104_v36, %v102_v39 }
  0xa2   :  { %v118_v42 = vadd.f32 1e-06, %v105_v40  ;;  %v110_v43 = vsub.f32 1.5, %v109_v41 }
  0xa4   :  { %v111_v44 = vmul.f32 %v322_v32, %v110_v43  ;;  %323 = vrcp.f32 %v118_v42 }
  0xa6   :  { %v112_v45 = vmul.f32 %v111_v44, %v93_v25 }
  0xa8   :  { %v114_v47 = vsel %vm113_vm2, %v93_v25, %v112_v45 }
  0xa9   :  { %v117_v48 = vsel %vm115_vm3, %v116_v46, %v114_v47 }
  0xaa   :  { %v119_v49 = vadd.f32 1e-06, %v117_v48  ;;  %v324_v50 = vpop.eup %323 }
  0xab   :  { %v125_v53 = vmul.f32 %v324_v50, %v123_v51 }
  0xac   :  { %325 = vrcp.f32 %v119_v49 }
  0xad   :  { %v130_v56 = vmul.f32 %v316_v52, %v125_v53 }
  0xaf   :  { %v136_v60 = vadd.f32 %v317_v58, %v130_v56 }
  0xb2   :  { %v326_v55 = vpop.eup %325 }
  0xb3   :  { %v126_v57 = vmul.f32 %v326_v55, %v124_v54 }
  0xb5   :  { %v131_v59 = vmul.f32 %v316_v52, %v126_v57 }
  0xb7   :  { %v137_v61 = vadd.f32 %v317_v58, %v131_v59 }
  0xb9   :  { %v306_v62 = vpack.c.bf16 %v137_v61, %v136_v60 }
  0xbb   :  { %307 = vst [vmem:[#allocation2] sm:$0xff] %v306_v62  }
  0xc2   :  { %v294_v63 = vld [vmem:[#allocation2] sm:$0xff] }
  0xc3   :  { %226 = vmatmul.bf16.vlgmr.msra.gmra.mxu0 %v294_v63 }
 0x140   :  { %v227_v3 = vpop.f32.mrf.mxu0 }
 0x141   :  { %v228_v4 = vadd.f32 %v318_v1, %v227_v3 }
 0x143   :  { %v234_v5 = vadd.f32 %v228_v4, %v479_v0 }
 0x145   :  { %236 = vst [vmem:[#allocation9] sm:$0xff] %v234_v5 }
 0x148   :  { %v229_v6 = vpop.f32.mrf.mxu0 }
 0x149   :  { %v230_v7 = vadd.f32 %v318_v1, %v229_v6 }
 0x14b   :  { %v235_v8 = vadd.f32 %v230_v7, %v484_v2 }
 0x14d   :  { %237 = vst [vmem:[#allocation9 + $0x8] sm:$0xff] %v235_v8 }
 0x14e   :  { %250 = dma.vmem_to_hbm [thread:$0]  %s243_s14, 256, %s245_s16, [#allocation5], %s431_s28, %s431_s28, %s432_s29  }
 0x14f   :  { %427 = dma.done.wait [#allocation5], 256  }
 0x150   :  { %428 = vsyncadd [#allocation5], 4294967040 }
 0x151   :  { %255 = vsyncpa [#allocation4], 1 }
 0x152   :  { %256 = vsyncpa [#allocation7], 1 }
 0x153   :  { %257 = vsyncpa [#allocation5], 1 }

</bundles_post_ra>
